<compile_context>
chip_gen: v7x
topology: tpu7x:2x2x1
jax: 0.10.0
libtpu: 0.0.40
codegen_flags: <defaults>
</compile_context>

<pallas_src>
import jax
import jax.numpy as jnp
from jax.experimental import pallas as pl
from jax.experimental.pallas import tpu as pltpu


# ----------------------------------------------------------------------------
# Sizing helpers (per-generation VMEM budget)
# ----------------------------------------------------------------------------
def _round_up(v, m):
    return (v + m - 1) // m * m


def _vmem_capacity_bytes():
    try:
        return int(pltpu.get_tpu_info().vmem_capacity_bytes)
    except Exception:
        return 64 * 2**20  # conservative fallback (v7x per-TC VMEM)


def _fixed_vmem_bytes(n_pad, dims, t_pad):
    """VMEM besides the A_hat stripe: scratch + (double-buffered) small inputs."""
    b = n_pad * sum(dims[1:]) * 2              # feats[l] scratch, bf16
    b += n_pad * dims[-1] * 4                  # z scratch, f32
    b += 2 * n_pad * dims[0] * 2               # x, bf16 (double-buffered block)
    for din, dout in zip(dims[:-1], dims[1:]):
        b += 2 * (din * dout * 2 + dout * 4)   # W bf16 + bias f32
    b += 2 * t_pad * 4                         # lane-dense score row
    return b


def _choose_tiling(num_nodes, dims, t_pad, budget):
    """Return (n_pad, tm).  tm == n_pad => A_hat fully VMEM-resident."""
    n8 = _round_up(max(num_nodes, 8), 8)
    # Resident: constant block index -> single DMA, reused across all layers.
    if 2 * n8 * n8 * 2 + _fixed_vmem_bytes(n8, dims, t_pad) <= budget:
        return n8, n8
    # Streamed: largest row stripe whose double-buffered tile fits the budget.
    for tm in (1024, 512, 256, 128):
        n_pad = _round_up(num_nodes, tm)
        if (2 * tm * n_pad * 2 + _fixed_vmem_bytes(n_pad, dims, t_pad) <= budget
                or tm == 128):
            return n_pad, tm


# ----------------------------------------------------------------------------
# Fused Pallas kernel: all GCN layers + target gather + edge score
# ----------------------------------------------------------------------------
def _make_seal_kernel(depth, dims, tm, n_tiles, num_targets, t_pad):
    """grid = (depth, n_tiles); axis 0 = layer phase, axis 1 = A_hat row tile."""

    def kernel(tgt_ref, a_ref, x_ref, *rest):
        wb = rest[:2 * depth]                         # W0, b0, W1, b1, ...
        o_ref = rest[2 * depth]                       # (1, t_pad) scores
        feats = rest[2 * depth + 1: 3 * depth + 1]    # feats[l]: (N, dims[l+1]) bf16
        z_ref = rest[3 * depth + 1]                   # (N, dims[-1]) f32

        p = pl.program_id(0)                          # layer phase
        i = pl.program_id(1)                          # row tile
        row = pl.multiple_of(i * tm, tm)

        # One-time prologue: feats[0] = x @ W0 (K = enc_dim is tiny, ~8).
        @pl.when(jnp.logical_and(p == 0, i == 0))
        def _():
            f0 = jnp.dot(x_ref[...], wb[0][...],
                         preferred_element_type=jnp.float32)
            feats[0][...] = f0.astype(jnp.bfloat16)

        # Layer-`p` aggregation for this row tile, with the *next* layer's
        # feature transform fused into the same step.
        for l in range(depth):
            is_last = l == depth - 1

            @pl.when(p == l)
            def _(l=l, is_last=is_last):
                h = jnp.dot(a_ref[...], feats[l][...],
                            preferred_element_type=jnp.float32)
                h = h + wb[2 * l + 1][...]
                if is_last:
                    z_ref[pl.ds(row, tm), :] = h      # keep f32 for the readout
                else:
                    h = jnp.maximum(h, 0.0)           # ReLU between layers
                    # TODO(synk): dropout(p=0.1) is identity in eval mode; skipped.
                    nxt = jnp.dot(h.astype(jnp.bfloat16), wb[2 * (l + 1)][...],
                                  preferred_element_type=jnp.float32)
                    feats[l + 1][pl.ds(row, tm), :] = nxt.astype(jnp.bfloat16)

        # Final grid step: gather the two target rows of z via scalar-prefetched
        # indices and emit the edge scores as one lane-dense row.
        @pl.when(jnp.logical_and(p == depth - 1, i == n_tiles - 1))
        def _():
            col = jax.lax.broadcasted_iota(jnp.int32, (1, t_pad), 1)
            acc = jnp.zeros((1, t_pad), jnp.float32)  # padded entries stay 0
            # TODO(synk): for large target counts, vectorize this gather loop.
            for k in range(num_targets):
                s = z_ref[pl.ds(tgt_ref[0, k], 1), :]          # (1, E)
                d = z_ref[pl.ds(tgt_ref[1, k], 1), :]
                sc = jnp.sum(s * d, axis=1, keepdims=True)     # (1, 1)
                acc = jnp.where(col == k, sc, acc)
            o_ref[...] = acc

    return kernel


# ----------------------------------------------------------------------------
# Plain-JAX glue
# ----------------------------------------------------------------------------
def build_norm_adj(edge_index, num_nodes, n_pad):
    """Dense D^{-1/2}(A+I)D^{-1/2} (gcn_norm), zero-padded to n_pad."""
    src, dst = edge_index[0], edge_index[1]
    loops = jnp.arange(num_nodes, dtype=src.dtype)
    src = jnp.concatenate([src, loops])
    dst = jnp.concatenate([dst, loops])
    ones = jnp.ones(src.shape[0], jnp.float32)
    deg = jnp.zeros(num_nodes, jnp.float32).at[dst].add(ones)
    dinv = jnp.where(deg > 0, 1.0 / jnp.sqrt(deg), 0.0)
    ew = dinv[src] * dinv[dst]
    a_hat = jnp.zeros((n_pad, n_pad), jnp.float32).at[dst, src].add(ew)
    return a_hat


def init_gcn_params(key, in_dim, hidden_dim, out_dim, depth):
    """GCN(in, hidden, depth, out): Glorot-uniform weights, zero biases."""
    dims = [in_dim] + [hidden_dim] * (depth - 1) + [out_dim]
    params = []
    for i in range(depth):
        key, wk = jax.random.split(key)
        fan_in, fan_out = dims[i], dims[i + 1]
        limit = jnp.sqrt(6.0 / (fan_in + fan_out))
        w = jax.random.uniform(wk, (fan_in, fan_out), jnp.float32, -limit, limit)
        b = jnp.zeros((fan_out,), jnp.float32)
        params.append((w, b))
    return params


def seal_forward(x, edge_index, targets, params, num_nodes):
    """Equivalent of SEAL.forward(x, ei, targets) in eval mode."""
    depth = len(params)
    t = int(targets.shape[1])
    f_in = int(x.shape[1])
    dims = [f_in] + [int(w.shape[1]) for (w, _) in params]
    t_pad = _round_up(t, 128)                     # lane-dense score row

    capacity = _vmem_capacity_bytes()
    budget = int(capacity * 0.75)                 # headroom for Mosaic internals
    n_pad, tm = _choose_tiling(num_nodes, dims, t_pad, budget)
    r = n_pad // tm

    # --- preprocessing / padding glue (outside the kernel) ---
    # TODO(synk): A_hat / weights / intermediate feats are bf16 with f32
    # accumulation; keep f32 if downstream scores are precision-sensitive.
    a_hat = build_norm_adj(edge_index, num_nodes, n_pad).astype(jnp.bfloat16)
    x_p = jnp.zeros((n_pad, f_in), jnp.bfloat16).at[:num_nodes].set(
        x.astype(jnp.bfloat16))
    tgt = targets.astype(jnp.int32)               # (2, T) -> SMEM scalar prefetch

    operands = [a_hat, x_p]
    in_specs = [pl.BlockSpec((tm, n_pad), lambda p, i, _: (i, 0)),
                pl.BlockSpec((n_pad, f_in), lambda p, i, _: (0, 0))]
    scratch_shapes = []
    for l, (w, b) in enumerate(params):
        d = dims[l + 1]
        operands += [w.astype(jnp.bfloat16), b.reshape(1, d).astype(jnp.float32)]
        in_specs += [pl.BlockSpec((dims[l], d), lambda p, i, _: (0, 0)),
                     pl.BlockSpec((1, d), lambda p, i, _: (0, 0))]
        scratch_shapes.append(pltpu.VMEM((n_pad, d), jnp.bfloat16))    # feats[l]
    scratch_shapes.append(pltpu.VMEM((n_pad, dims[-1]), jnp.float32))  # z (f32)

    a_bytes = 2 * tm * n_pad * 2                  # double-buffered A_hat stripe
    est = a_bytes + _fixed_vmem_bytes(n_pad, dims, t_pad)
    vmem_limit = int(min(max(est + 8 * 2**20, 32 * 2**20), int(capacity * 0.9)))

    kernel = _make_seal_kernel(depth, dims, tm, r, t, t_pad)
    out = pl.pallas_call(
        kernel,
        out_shape=jax.ShapeDtypeStruct((1, t_pad), jnp.float32),
        grid_spec=pltpu.PrefetchScalarGridSpec(
            num_scalar_prefetch=1,
            grid=(depth, r),
            in_specs=in_specs,
            out_specs=pl.BlockSpec((1, t_pad), lambda p, i, _: (0, 0)),
            scratch_shapes=scratch_shapes),
        compiler_params=pltpu.CompilerParams(
            dimension_semantics=("arbitrary", "arbitrary"),
            vmem_limit_bytes=vmem_limit),
    )(tgt, *operands)

    # TODO(synk): batch many SEAL subgraphs per call with a leading "parallel"
    # subgraph axis to use both v7x TensorCores / fill the MXU.
    return out[0, :t].reshape(t, 1)


# ----------------------------------------------------------------------------
# Demo
# ----------------------------------------------------------------------------
if __name__ == "__main__":
    khops = 2
    enc_dim = (2 + khops) * 2          # 8
    hidden = 64
    embed_size = 32
    gnn_depth = khops                  # 2 GCN layers: 8 -> 64 -> 32

    num_nodes = 16
    num_edges = 40
    num_targets = 4

    key = jax.random.PRNGKey(0)
    k_ei, k_dx, k_dy, k_tg, k_par = jax.random.split(key, 5)

    # Random directed edge_index [2, E]
    edge_index = jax.random.randint(k_ei, (2, num_edges), 0, num_nodes, jnp.int32)

    # Node features mimicking one_hot_node_distance: two ones per row.
    dx = jax.random.randint(k_dx, (num_nodes,), 0, khops + 2, jnp.int32)
    dy = jax.random.randint(k_dy, (num_nodes,), 0, khops + 2, jnp.int32)
    rows = jnp.arange(num_nodes)
    x = jnp.zeros((num_nodes, enc_dim), jnp.float32)
    x = x.at[rows, dx].set(1.0)
    x = x.at[rows, dy + khops + 2].set(1.0)

    # Query targets [2, T] (src/dst node indices per query edge)
    targets = jax.random.randint(k_tg, (2, num_targets), 0, num_nodes, jnp.int32)

    params = init_gcn_params(k_par, enc_dim, hidden, embed_size, gnn_depth)

    out = seal_forward(x, edge_index, targets, params, num_nodes)
    out = jax.block_until_ready(out)
    assert out.shape == (num_targets, 1)
    print("KERNEL_OK")
</pallas_src>

<mosaic_0001>
module attributes {stable_mosaic.version = 11 : i64} {
  func.func @kernel(%arg0: i32, %arg1: i32, %arg2: memref<2x4xi32, #tpu.memory_space<smem>>, %arg3: memref<16x16xbf16, #tpu.memory_space<vmem>>, %arg4: memref<16x8xbf16, #tpu.memory_space<vmem>>, %arg5: memref<8x64xbf16, #tpu.memory_space<vmem>>, %arg6: memref<1x64xf32, #tpu.memory_space<vmem>>, %arg7: memref<64x32xbf16, #tpu.memory_space<vmem>>, %arg8: memref<1x32xf32, #tpu.memory_space<vmem>>, %arg9: memref<1x128xf32, #tpu.memory_space<vmem>>, %arg10: memref<16x64xbf16, #tpu.memory_space<vmem>>, %arg11: memref<16x32xbf16, #tpu.memory_space<vmem>>, %arg12: memref<16x32xf32, #tpu.memory_space<vmem>>) attributes {dimension_semantics = [#tpu.dimension_semantics<arbitrary>, #tpu.dimension_semantics<arbitrary>], iteration_bounds = array<i64: 2, 1>, scalar_prefetch = 1 : i64, scratch_operands = 3 : i64, tpu.core_type = #tpu.core_type<tc>, window_params = [{transform_indices = @transform_0, window_bounds = array<i64: 16, 16>}, {pipeline_mode = #tpu.pipeline_mode<synchronous>, transform_indices = @transform_1, window_bounds = array<i64: 16, 8>}, {pipeline_mode = #tpu.pipeline_mode<synchronous>, transform_indices = @transform_2, window_bounds = array<i64: 8, 64>}, {pipeline_mode = #tpu.pipeline_mode<synchronous>, transform_indices = @transform_3, window_bounds = array<i64: 1, 64>}, {pipeline_mode = #tpu.pipeline_mode<synchronous>, transform_indices = @transform_4, window_bounds = array<i64: 64, 32>}, {pipeline_mode = #tpu.pipeline_mode<synchronous>, transform_indices = @transform_5, window_bounds = array<i64: 1, 32>}, {pipeline_mode = #tpu.pipeline_mode<synchronous>, transform_indices = @transform_6, window_bounds = array<i64: 1, 128>}]} {
    %c16_i32 = arith.constant 16 : i32
    %0 = arith.muli %arg1, %c16_i32 : i32
    %1 = tpu.assume_multiple %0, 16 : i32
    %c0_i32 = arith.constant 0 : i32
    %2 = arith.cmpi eq, %arg0, %c0_i32 : i32
    %c0_i32_0 = arith.constant 0 : i32
    %3 = arith.cmpi eq, %arg1, %c0_i32_0 : i32
    %4 = arith.andi %2, %3 : i1
    %5 = arith.extui %4 : i1 to i32
    %c0_i32_1 = arith.constant 0 : i32
    %6 = arith.cmpi ne, %5, %c0_i32_1 : i32
    scf.if %6 {
      %c0 = arith.constant 0 : index
      %c0_8 = arith.constant 0 : index
      %18 = vector.load %arg4[%c0, %c0_8] : memref<16x8xbf16, #tpu.memory_space<vmem>>, vector<16x8xbf16>
      %c0_9 = arith.constant 0 : index
      %c0_10 = arith.constant 0 : index
      %19 = vector.load %arg5[%c0_9, %c0_10] : memref<8x64xbf16, #tpu.memory_space<vmem>>, vector<8x64xbf16>
      %cst = arith.constant dense<0.000000e+00> : vector<16x64xf32>
      %20 = tpu.matmul %18, %19, %cst {dimension_numbers = #tpu.dot_dimension_numbers<[1], [0], [0], [1], [0, 0, 1, 1], [], []>} : vector<16x8xbf16>, vector<8x64xbf16>, vector<16x64xf32> -> vector<16x64xf32>
      %21 = arith.truncf %20 : vector<16x64xf32> to vector<16x64xbf16>
      %c0_11 = arith.constant 0 : index
      %c0_12 = arith.constant 0 : index
      %22 = vector.load %arg10[%c0_11, %c0_12] : memref<16x64xbf16, #tpu.memory_space<vmem>>, vector<16x64xbf16>
      tpu.vector_store %arg10[%c0_11, %c0_12], %21 {strides = array<i32>} : memref<16x64xbf16, #tpu.memory_space<vmem>>, vector<16x64xbf16>,
    } else {
    }
    %c0_i32_2 = arith.constant 0 : i32
    %7 = arith.cmpi eq, %arg0, %c0_i32_2 : i32
    %8 = arith.extui %7 : i1 to i32
    %c0_i32_3 = arith.constant 0 : i32
    %9 = arith.cmpi ne, %8, %c0_i32_3 : i32
    scf.if %9 {
      %c0 = arith.constant 0 : index
      %c0_8 = arith.constant 0 : index
      %18 = vector.load %arg3[%c0, %c0_8] : memref<16x16xbf16, #tpu.memory_space<vmem>>, vector<16x16xbf16>
      %c0_9 = arith.constant 0 : index
      %c0_10 = arith.constant 0 : index
      %19 = vector.load %arg10[%c0_9, %c0_10] : memref<16x64xbf16, #tpu.memory_space<vmem>>, vector<16x64xbf16>
      %cst = arith.constant dense<0.000000e+00> : vector<16x64xf32>
      %20 = tpu.matmul %18, %19, %cst {dimension_numbers = #tpu.dot_dimension_numbers<[1], [0], [0], [1], [0, 0, 1, 1], [], []>} : vector<16x16xbf16>, vector<16x64xbf16>, vector<16x64xf32> -> vector<16x64xf32>
      %c0_11 = arith.constant 0 : index
      %c0_12 = arith.constant 0 : index
      %21 = vector.load %arg6[%c0_11, %c0_12] : memref<1x64xf32, #tpu.memory_space<vmem>>, vector<1x64xf32>
      %22 = vector.broadcast %21 : vector<1x64xf32> to vector<16x64xf32>
      %23 = arith.addf %20, %22 : vector<16x64xf32>
      %cst_13 = arith.constant 0.000000e+00 : f32
      %24 = vector.broadcast %cst_13 : f32 to vector<16x64xf32>
      %25 = arith.maximumf %23, %24 : vector<16x64xf32>
      %26 = arith.truncf %25 : vector<16x64xf32> to vector<16x64xbf16>
      %c0_14 = arith.constant 0 : index
      %c0_15 = arith.constant 0 : index
      %27 = vector.load %arg7[%c0_14, %c0_15] : memref<64x32xbf16, #tpu.memory_space<vmem>>, vector<64x32xbf16>
      %cst_16 = arith.constant dense<0.000000e+00> : vector<16x32xf32>
      %28 = tpu.matmul %26, %27, %cst_16 {dimension_numbers = #tpu.dot_dimension_numbers<[1], [0], [0], [1], [0, 0, 1, 1], [], []>} : vector<16x64xbf16>, vector<64x32xbf16>, vector<16x32xf32> -> vector<16x32xf32>
      %29 = arith.truncf %28 : vector<16x32xf32> to vector<16x32xbf16>
      %30 = arith.index_cast %1 : i32 to index
      %c0_17 = arith.constant 0 : index
      %31 = vector.load %arg11[%30, %c0_17] : memref<16x32xbf16, #tpu.memory_space<vmem>>, vector<16x32xbf16>
      tpu.vector_store %arg11[%30, %c0_17], %29 {strides = array<i32>} : memref<16x32xbf16, #tpu.memory_space<vmem>>, vector<16x32xbf16>,
    } else {
    }
    %c1_i32 = arith.constant 1 : i32
    %10 = arith.cmpi eq, %arg0, %c1_i32 : i32
    %11 = arith.extui %10 : i1 to i32
    %c0_i32_4 = arith.constant 0 : i32
    %12 = arith.cmpi ne, %11, %c0_i32_4 : i32
    scf.if %12 {
      %c0 = arith.constant 0 : index
      %c0_8 = arith.constant 0 : index
      %18 = vector.load %arg3[%c0, %c0_8] : memref<16x16xbf16, #tpu.memory_space<vmem>>, vector<16x16xbf16>
      %c0_9 = arith.constant 0 : index
      %c0_10 = arith.constant 0 : index
      %19 = vector.load %arg11[%c0_9, %c0_10] : memref<16x32xbf16, #tpu.memory_space<vmem>>, vector<16x32xbf16>
      %cst = arith.constant dense<0.000000e+00> : vector<16x32xf32>
      %20 = tpu.matmul %18, %19, %cst {dimension_numbers = #tpu.dot_dimension_numbers<[1], [0], [0], [1], [0, 0, 1, 1], [], []>} : vector<16x16xbf16>, vector<16x32xbf16>, vector<16x32xf32> -> vector<16x32xf32>
      %c0_11 = arith.constant 0 : index
      %c0_12 = arith.constant 0 : index
      %21 = vector.load %arg8[%c0_11, %c0_12] : memref<1x32xf32, #tpu.memory_space<vmem>>, vector<1x32xf32>
      %22 = vector.broadcast %21 : vector<1x32xf32> to vector<16x32xf32>
      %23 = arith.addf %20, %22 : vector<16x32xf32>
      %24 = arith.index_cast %1 : i32 to index
      %c0_13 = arith.constant 0 : index
      %25 = vector.load %arg12[%24, %c0_13] : memref<16x32xf32, #tpu.memory_space<vmem>>, vector<16x32xf32>
      tpu.vector_store %arg12[%24, %c0_13], %23 {strides = array<i32>} : memref<16x32xf32, #tpu.memory_space<vmem>>, vector<16x32xf32>,
    } else {
    }
    %c1_i32_5 = arith.constant 1 : i32
    %13 = arith.cmpi eq, %arg0, %c1_i32_5 : i32
    %c0_i32_6 = arith.constant 0 : i32
    %14 = arith.cmpi eq, %arg1, %c0_i32_6 : i32
    %15 = arith.andi %13, %14 : i1
    %16 = arith.extui %15 : i1 to i32
    %c0_i32_7 = arith.constant 0 : i32
    %17 = arith.cmpi ne, %16, %c0_i32_7 : i32
    scf.if %17 {
      %18 = tpu.iota {dimensions = array<i32: 1>} : vector<1x128xi32>
      %cst = arith.constant 0.000000e+00 : f32
      %19 = vector.broadcast %cst : f32 to vector<1x128xf32>
      %c0 = arith.constant 0 : index
      %c0_8 = arith.constant 0 : index
      %20 = memref.load %arg2[%c0, %c0_8] : memref<2x4xi32, #tpu.memory_space<smem>>
      %21 = arith.index_cast %20 : i32 to index
      %c0_9 = arith.constant 0 : index
      %22 = vector.load %arg12[%21, %c0_9] : memref<16x32xf32, #tpu.memory_space<vmem>>, vector<1x32xf32>
      %c1 = arith.constant 1 : index
      %c0_10 = arith.constant 0 : index
      %23 = memref.load %arg2[%c1, %c0_10] : memref<2x4xi32, #tpu.memory_space<smem>>
      %24 = arith.index_cast %23 : i32 to index
      %c0_11 = arith.constant 0 : index
      %25 = vector.load %arg12[%24, %c0_11] : memref<16x32xf32, #tpu.memory_space<vmem>>, vector<1x32xf32>
      %26 = arith.mulf %22, %25 : vector<1x32xf32>
      %cst_12 = arith.constant dense<0.000000e+00> : vector<1xf32>
      %27 = vector.multi_reduction <add>, %26, %cst_12 [1] : vector<1x32xf32> to vector<1xf32>
      %28 = vector.shape_cast %27 : vector<1xf32> to vector<1x1xf32>
      %c0_i32_13 = arith.constant 0 : i32
      %29 = vector.broadcast %c0_i32_13 : i32 to vector<1x128xi32>
      %30 = arith.cmpi eq, %18, %29 : vector<1x128xi32>
      %31 = vector.shape_cast %28 : vector<1x1xf32> to vector<1x1xf32>
      %32 = vector.broadcast %31 : vector<1x1xf32> to vector<1x128xf32>
      %33 = arith.select %30, %32, %19 : vector<1x128xi1>, vector<1x128xf32>
      %c0_14 = arith.constant 0 : index
      %c1_15 = arith.constant 1 : index
      %34 = memref.load %arg2[%c0_14, %c1_15] : memref<2x4xi32, #tpu.memory_space<smem>>
      %35 = arith.index_cast %34 : i32 to index
      %c0_16 = arith.constant 0 : index
      %36 = vector.load %arg12[%35, %c0_16] : memref<16x32xf32, #tpu.memory_space<vmem>>, vector<1x32xf32>
      %c1_17 = arith.constant 1 : index
      %c1_18 = arith.constant 1 : index
      %37 = memref.load %arg2[%c1_17, %c1_18] : memref<2x4xi32, #tpu.memory_space<smem>>
      %38 = arith.index_cast %37 : i32 to index
      %c0_19 = arith.constant 0 : index
      %39 = vector.load %arg12[%38, %c0_19] : memref<16x32xf32, #tpu.memory_space<vmem>>, vector<1x32xf32>
      %40 = arith.mulf %36, %39 : vector<1x32xf32>
      %cst_20 = arith.constant dense<0.000000e+00> : vector<1xf32>
      %41 = vector.multi_reduction <add>, %40, %cst_20 [1] : vector<1x32xf32> to vector<1xf32>
      %42 = vector.shape_cast %41 : vector<1xf32> to vector<1x1xf32>
      %c1_i32_21 = arith.constant 1 : i32
      %43 = vector.broadcast %c1_i32_21 : i32 to vector<1x128xi32>
      %44 = arith.cmpi eq, %18, %43 : vector<1x128xi32>
      %45 = vector.shape_cast %42 : vector<1x1xf32> to vector<1x1xf32>
      %46 = vector.broadcast %45 : vector<1x1xf32> to vector<1x128xf32>
      %47 = arith.select %44, %46, %33 : vector<1x128xi1>, vector<1x128xf32>
      %c0_22 = arith.constant 0 : index
      %c2 = arith.constant 2 : index
      %48 = memref.load %arg2[%c0_22, %c2] : memref<2x4xi32, #tpu.memory_space<smem>>
      %49 = arith.index_cast %48 : i32 to index
      %c0_23 = arith.constant 0 : index
      %50 = vector.load %arg12[%49, %c0_23] : memref<16x32xf32, #tpu.memory_space<vmem>>, vector<1x32xf32>
      %c1_24 = arith.constant 1 : index
      %c2_25 = arith.constant 2 : index
      %51 = memref.load %arg2[%c1_24, %c2_25] : memref<2x4xi32, #tpu.memory_space<smem>>
      %52 = arith.index_cast %51 : i32 to index
      %c0_26 = arith.constant 0 : index
      %53 = vector.load %arg12[%52, %c0_26] : memref<16x32xf32, #tpu.memory_space<vmem>>, vector<1x32xf32>
      %54 = arith.mulf %50, %53 : vector<1x32xf32>
      %cst_27 = arith.constant dense<0.000000e+00> : vector<1xf32>
      %55 = vector.multi_reduction <add>, %54, %cst_27 [1] : vector<1x32xf32> to vector<1xf32>
      %56 = vector.shape_cast %55 : vector<1xf32> to vector<1x1xf32>
      %c2_i32 = arith.constant 2 : i32
      %57 = vector.broadcast %c2_i32 : i32 to vector<1x128xi32>
      %58 = arith.cmpi eq, %18, %57 : vector<1x128xi32>
      %59 = vector.shape_cast %56 : vector<1x1xf32> to vector<1x1xf32>
      %60 = vector.broadcast %59 : vector<1x1xf32> to vector<1x128xf32>
      %61 = arith.select %58, %60, %47 : vector<1x128xi1>, vector<1x128xf32>
      %c0_28 = arith.constant 0 : index
      %c3 = arith.constant 3 : index
      %62 = memref.load %arg2[%c0_28, %c3] : memref<2x4xi32, #tpu.memory_space<smem>>
      %63 = arith.index_cast %62 : i32 to index
      %c0_29 = arith.constant 0 : index
      %64 = vector.load %arg12[%63, %c0_29] : memref<16x32xf32, #tpu.memory_space<vmem>>, vector<1x32xf32>
      %c1_30 = arith.constant 1 : index
      %c3_31 = arith.constant 3 : index
      %65 = memref.load %arg2[%c1_30, %c3_31] : memref<2x4xi32, #tpu.memory_space<smem>>
      %66 = arith.index_cast %65 : i32 to index
      %c0_32 = arith.constant 0 : index
      %67 = vector.load %arg12[%66, %c0_32] : memref<16x32xf32, #tpu.memory_space<vmem>>, vector<1x32xf32>
      %68 = arith.mulf %64, %67 : vector<1x32xf32>
      %cst_33 = arith.constant dense<0.000000e+00> : vector<1xf32>
      %69 = vector.multi_reduction <add>, %68, %cst_33 [1] : vector<1x32xf32> to vector<1xf32>
      %70 = vector.shape_cast %69 : vector<1xf32> to vector<1x1xf32>
      %c3_i32 = arith.constant 3 : i32
      %71 = vector.broadcast %c3_i32 : i32 to vector<1x128xi32>
      %72 = arith.cmpi eq, %18, %71 : vector<1x128xi32>
      %73 = vector.shape_cast %70 : vector<1x1xf32> to vector<1x1xf32>
      %74 = vector.broadcast %73 : vector<1x1xf32> to vector<1x128xf32>
      %75 = arith.select %72, %74, %61 : vector<1x128xi1>, vector<1x128xf32>
      %c0_34 = arith.constant 0 : index
      %c0_35 = arith.constant 0 : index
      %76 = vector.load %arg9[%c0_34, %c0_35] : memref<1x128xf32, #tpu.memory_space<vmem>>, vector<1x128xf32>
      tpu.vector_store %arg9[%c0_34, %c0_35], %75 {strides = array<i32>} : memref<1x128xf32, #tpu.memory_space<vmem>>, vector<1x128xf32>,
    } else {
    }
    return
  }
  func.func @transform_0(%arg0: i32, %arg1: i32, %arg2: memref<2x4xi32, #tpu.memory_space<smem>>) -> (i32, i32) {
    %c0_i32 = arith.constant 0 : i32
    %c0_i32_0 = arith.constant 0 : i32
    return %arg1, %c0_i32 : i32, i32
  }
  func.func @transform_1(%arg0: i32, %arg1: i32, %arg2: memref<2x4xi32, #tpu.memory_space<smem>>) -> (i32, i32) {
    %c0_i32 = arith.constant 0 : i32
    %c0_i32_0 = arith.constant 0 : i32
    %c0_i32_1 = arith.constant 0 : i32
    return %c0_i32, %c0_i32_0 : i32, i32
  }
  func.func @transform_2(%arg0: i32, %arg1: i32, %arg2: memref<2x4xi32, #tpu.memory_space<smem>>) -> (i32, i32) {
    %c0_i32 = arith.constant 0 : i32
    %c0_i32_0 = arith.constant 0 : i32
    %c0_i32_1 = arith.constant 0 : i32
    return %c0_i32, %c0_i32_0 : i32, i32
  }
  func.func @transform_3(%arg0: i32, %arg1: i32, %arg2: memref<2x4xi32, #tpu.memory_space<smem>>) -> (i32, i32) {
    %c0_i32 = arith.constant 0 : i32
    %c0_i32_0 = arith.constant 0 : i32
    %c0_i32_1 = arith.constant 0 : i32
    return %c0_i32, %c0_i32_0 : i32, i32
  }
  func.func @transform_4(%arg0: i32, %arg1: i32, %arg2: memref<2x4xi32, #tpu.memory_space<smem>>) -> (i32, i32) {
    %c0_i32 = arith.constant 0 : i32
    %c0_i32_0 = arith.constant 0 : i32
    %c0_i32_1 = arith.constant 0 : i32
    return %c0_i32, %c0_i32_0 : i32, i32
  }
  func.func @transform_5(%arg0: i32, %arg1: i32, %arg2: memref<2x4xi32, #tpu.memory_space<smem>>) -> (i32, i32) {
    %c0_i32 = arith.constant 0 : i32
    %c0_i32_0 = arith.constant 0 : i32
    %c0_i32_1 = arith.constant 0 : i32
    return %c0_i32, %c0_i32_0 : i32, i32
  }
  func.func @transform_6(%arg0: i32, %arg1: i32, %arg2: memref<2x4xi32, #tpu.memory_space<smem>>) -> (i32, i32) {
    %c0_i32 = arith.constant 0 : i32
    %c0_i32_0 = arith.constant 0 : i32
    %c0_i32_1 = arith.constant 0 : i32
    return %c0_i32, %c0_i32_0 : i32, i32
  }
}

</mosaic_0001>

<bundles_post_ra>
// kernel: tpu_custom_call.1
= control target key start
LH: loop header
LB: loop body
LE: loop exit
PB: predicated region body
PF: predicated region fallthrough
CT: control target
= control target key end

     0   :  { %s1008_s0 = inlined_call_operand.vmem [shape: s32[2,4], index: 0, kind: input, shape index: {}]   ;;  %s1009_s1 = inlined_call_operand.vmem [shape: bf16[16,16], index: 1, kind: input, shape index: {}]   ;;  %s1010_s2 = inlined_call_operand.vmem [shape: bf16[16,8], index: 2, kind: input, shape index: {}]   ;;  %s1011_s3 = inlined_call_operand.vmem [shape: bf16[8,64], index: 3, kind: input, shape index: {}]   ;;  %s1012_s4 = inlined_call_operand.vmem [shape: f32[1,64], index: 4, kind: input, shape index: {}]   ;;  %s1013_s5 = inlined_call_operand.vmem [shape: bf16[64,32], index: 5, kind: input, shape index: {}]   ;;  %s1014_s6 = inlined_call_operand.vmem [shape: f32[1,32], index: 6, kind: input, shape index: {}]   ;;  %s1015_s7 = inlined_call_operand.hbm [shape: f32[1,128], index: 7, kind: output, shape index: {}]  }
   0x1   :  { %s12_s26 = sshll.u32 %s1008_s0, 4  ;;  %s13_s26 = int_to_ptr.vmem [resolvable:$true] %s12_s26 }
   0x2   :  { %s791_s27 = scalar_lea.vmem %s13_s26, 32  ;;  %p796_p1 = scmp.lt.s32.totalorder %s13_s26, %s13_s26 }
   0x3   :  { %p792_p0 = scmp.ne.s32.totalorder %s13_s26, %s791_s27  ;;  %p797_p2 = scmp.lt.s32.totalorder %s791_s27, %s791_s27 }
   0x5   :  { %p798_p3 = por %p797_p2, %p796_p1 }
   0x7   :  { %p799_p4 = pnand %p798_p3, %p792_p0 }
   0x9   :  { %802 = shalt.err (!%p799_p4)  }
   0xa   :  { %s859_s28 = smov [#allocation6]  }
   0xb   :  { %15 = dma.vmem_to_smem %s13_s26, 32, %s859_s28, [#allocation5] }
   0xc   :  { %841 = dma.done.wait [#allocation5], 32 }
   0xd   :  { %842 = vsyncadd [#allocation5], 4294967264 }
   0xe   :  { %17 = sfence }
   0xf   :  { %18 = vsyncpa [#allocation8], 0  ;;  %s910_s29 = smov 0   ;;  %s912_s30 = smov 0  }
  0x10   :  { %s914_s8 = smov 0  }
  0x11 LB: > { %s671_s0 = sadd.s32 4294967295, %s857_s8   ;;  %s36_s9 = sadd.s32 1, %s853_s30  ;;  %s857_s8 = sphi %s914_s8, %s24_s8   ;;  %s853_s30 = sphi %s912_s30, %s1018_s30   ;;  %s849_s29 = sphi %s910_s29, %s1017_s29  }
  0x12   : > { %p38_p5 = scmp.ge.s32.totalorder %s36_s9, 2  ;;  %p674_p6 = scmp.ge.s32.totalorder %s857_s8, 1 }
  0x13   : > { %p228_p7 = scmp.lt.s32.totalorder %s857_s8, 3 }
  0x14   : > { %s1020_s9 = smov (%p38_p5, %s36_s9), 0 }
  0x15   : > { %p229_p8 = pnand %p674_p6, %p228_p7 }
  0x16   : > { %p261_p9 = scmp.eq.s32.totalorder (!%p229_p8), %s849_s29, 0 }
  0x17   : > { %232 = sbr.rel (%p229_p8) target bundleno = 1113 (0x459), region = 44 }
  0x1e   : > { %266 = sbr.rel (!%p261_p9) target bundleno = 252 (0xfc), region = 48  ;;  %v269_v0 = vld [vmem:[%s1011_s3] sm:$0xf] (%p261_p9)  ;;  %vm279_vm0 = vcmask (%p261_p9), 1043456   ;;  %v860_v1 = vmov (%p261_p9), 0.0   ;;  %vm861_vm1 = vmmov (%p261_p9), 0  }
  0x1f   : > { %716 = vmatprep.subr.bf16.mxu0 (%p261_p9), %v860_v1  ;;  %v281_v2 = vsel (%p261_p9), %vm279_vm0, %v269_v0, 0  ;;  %718 = vmatprep.mubr.msk.bf16.mxu0 (%p261_p9), %vm861_vm1, %v860_v1  ;;  %v784_v3 = vld [vmem:[%s1010_s2] sm:$0xff] (%p261_p9)   ;;  %vm275_vm2 = vcmask (%p261_p9), 64512   ;;  %vm325_vm3 = vcmask (%p261_p9), 523264  }
  0x20   : > { %717 = vmatpush3.bf16.msra.mxu0 (%p261_p9), %v281_v2 }
  0x23   : > { %719 = vmatmul.mubr.msk.bf16.vlgmr.msra.gmra.mrb[0].mxu0 (%p261_p9), %vm275_vm2, %v784_v3 }
  0xf6   : > { %v317_v4 = vpop.f32.mrb[0].mxu0 }
  0xf7   : > { %v720_v5 = vpop.f32.mrb[1].mxu0 }
  0xf8   : > { %v320_v6 = vpop.f32.mrb[2].mxu0 }
  0xf9   : > { %v324_v7 = vpack.c.bf16 %v320_v6, %v317_v4  ;;  %v721_v8 = vpop.f32.mrb[3].mxu0 }
  0xfb   : > { %326 = vst.msk [vmem:[#allocation2] sm:$0xff] %vm325_vm3, %v324_v7 }
  0xfc PF: > { %p678_p10 = scmp.ne.s32.totalorder %s849_s29, 0 }
  0xfd   : > { %v785_v10 = vld [vmem:[%s1009_s1] sm:$0xff] (!%p678_p10)   ;;  %v862_v11 = vmov (!%p678_p10), 0.0   ;;  %vm863_vm4 = vmmov (!%p678_p10), 0   ;;  %vm345_vm5 = vcmask (!%p678_p10), 130048   ;;  %v787_v13 = vld [vmem:[%s1013_s5 + $0x8] sm:$0xff] (!%p678_p10)   ;;  %v788_v14 = vld [vmem:[%s1013_s5 + $0x10] sm:$0xff] (!%p678_p10)  }
  0xfe   : > { %329 = sbr.rel (%p678_p10) target bundleno = 699 (0x2bb), region = 52  ;;  %722 = vmatprep.subr.bf16.mxu0 (!%p678_p10), %v862_v11  ;;  %724 = vmatprep.mubr.msk.bf16.mxu0 (!%p678_p10), %vm863_vm4, %v862_v11  ;;  %v786_v12 = vld [vmem:[%s1013_s5] sm:$0xff] (!%p678_p10)   ;;  %v789_v15 = vld [vmem:[%s1013_s5 + $0x18] sm:$0xff] (!%p678_p10)   ;;  %vm425_vm6 = vcmask (!%p678_p10), 523264   ;;  %vm475_vm7 = vcmask (!%p678_p10), 261120  }
  0xff   : > { %728 = vmatprep.subr.bf16.mxu1 (!%p678_p10), %v862_v11  ;;  %736 = vmatprep.mubr.msk.bf16.mxu1 (!%p678_p10), %vm863_vm4, %v862_v11  ;;  %v679_v16 = vld [vmem:[%s1012_s4] ss:$0 sm:$0xff] (!%p678_p10) }
 0x100   : > { %729 = vmatpush3.bf16.msra.mxu1 (!%p678_p10), %v786_v12 }
 0x101   : > { %730 = vmatprep.subr.bf16.mxu1 (!%p678_p10), %v862_v11 }
 0x102   : > { %v332_v9 = vld [vmem:[#allocation2] sm:$0xff] (!%p678_p10) }
 0x103   : > { %723 = vmatpush3.bf16.msra.mxu0 (!%p678_p10), %v332_v9 }
 0x104   : > { %731 = vmatpush3.bf16.msra.mxu1 (!%p678_p10), %v787_v13 }
 0x105   : > { %732 = vmatprep.subr.bf16.mxu1 %v862_v11 }
 0x106   : > { %725 = vmatmul.mubr.msk.bf16.vlgmr.msra.gmra.mrb[0].mxu0 %vm345_vm5, %v785_v10 }
 0x108   : > { %733 = vmatpush3.bf16.msra.mxu1 %v788_v14 }
 0x109   : > { %734 = vmatprep.subr.bf16.mxu1 %v862_v11 }
 0x10c   : > { %735 = vmatpush3.bf16.msra.mxu1 %v789_v15 }
 0x1d9   : > { %v383_v17 = vpop.f32.mrb[0].mxu0 }
 0x1da   : > { %v384_v18 = vadd.f32 %v679_v16, %v383_v17  ;;  %v726_v19 = vpop.f32.mrb[1].mxu0 }
 0x1db   : > { %v386_v20 = vpop.f32.mrb[2].mxu0 }
 0x1dc   : > { %v387_v21 = vadd.f32 %v679_v16, %v386_v20  ;;  %v727_v22 = vpop.f32.mrb[3].mxu0  ;;  %v390_v23 = vmax.f32 %v384_v18, 0.0 }
 0x1de   : > { %v391_v24 = vmax.f32 %v387_v21, 0.0 }
 0x1e0   : > { %v392_v25 = vpack.c.bf16 %v391_v24, %v390_v23 }
 0x1e2   : > { %737 = vmatmul.mubr.msk.bf16.vlgmr.msra.gmra.mrb[0].mxu1 %vm425_vm6, %v392_v25 }
 0x2b5   : > { %v463_v26 = vpop.f32.mrb[0].mxu1 }
 0x2b6   : > { %v738_v27 = vpop.f32.mrb[1].mxu1 }
 0x2b7   : > { %v466_v28 = vpop.f32.mrb[2].mxu1 }
 0x2b8   : > { %v470_v29 = vpack.c.bf16 %v466_v28, %v463_v26  ;;  %v739_v30 = vpop.f32.mrb[3].mxu1 }
 0x2ba   : > { %476 = vst.msk [vmem:[#allocation3] sm:$0xff] %vm475_vm7, %v470_v29 }
 0x2bb PF: > { %p477_p11 = scmp.eq.s32.totalorder %s849_s29, 1  ;;  %p687_p12 = scmp.ne.s32.totalorder %s849_s29, 1 }
 0x2bc   : > { %v864_v32 = vmov (!%p687_p12), 0.0   ;;  %vm865_vm8 = vmmov (!%p687_p12), 0   ;;  %v790_v33 = vld [vmem:[%s1009_s1] sm:$0xff] (!%p687_p12)   ;;  %vm496_vm9 = vcmask (!%p687_p12), 130048   ;;  %vm542_vm10 = vcmask (!%p687_p12), 261120  }
 0x2bd   : > { %480 = sbr.rel (%p687_p12) target bundleno = 926 (0x39e), region = 56  ;;  %740 = vmatprep.subr.bf16.mxu0 (!%p687_p12), %v864_v32  ;;  %742 = vmatprep.mubr.msk.bf16.mxu0 (!%p687_p12), %vm865_vm8, %v864_v32  ;;  %v688_v34 = vld [vmem:[%s1014_s6] ss:$0 sm:$0xff] (!%p687_p12) }
 0x2c1   : > { %v483_v31 = vld [vmem:[#allocation3] sm:$0xff] (!%p687_p12) }
 0x2c2   : > { %741 = vmatpush3.bf16.msra.mxu0 (!%p687_p12), %v483_v31 }
 0x2c5   : > { %743 = vmatmul.mubr.msk.bf16.vlgmr.msra.gmra.mrb[0].mxu0 %vm496_vm9, %v790_v33 }
 0x398   : > { %v534_v35 = vpop.f32.mrb[0].mxu0 }
 0x399   : > { %v535_v36 = vadd.f32 %v688_v34, %v534_v35  ;;  %v744_v37 = vpop.f32.mrb[1].mxu0 }
 0x39a   : > { %v537_v38 = vpop.f32.mrb[2].mxu0 }
 0x39b   : > { %543 = vst.msk [vmem:[#allocation4] sm:$0xff] %vm542_vm10, %v535_v36  ;;  %v538_v39 = vadd.f32 %v688_v34, %v537_v38  ;;  %v745_v40 = vpop.f32.mrb[3].mxu0 }
 0x39d   : > { %544 = vst.msk [vmem:[#allocation4 + $0x8] sm:$0xff] %vm542_vm10, %v538_v39 }
 0x39e PF: > { %548 = sbr.rel (!%p477_p11) target bundleno = 1088 (0x440), region = 60  ;;  %s551_s11 = sld [smem:[#allocation6]] (%p477_p11)  ;;  %vm558_vm11 = vcmask (%p477_p11), 253952   ;;  %v549_v57 = vlaneseq (%p477_p11) }
 0x39f   : > { %s692_s12 = sld [smem:[#allocation6 + $0x80]] (%p477_p11)  ;;  %s695_s13 = sld [smem:[#allocation6 + $0x2]] (%p477_p11) }
 0x3a0   : > { %s696_s14 = sld [smem:[#allocation6 + $0x82]] (%p477_p11)  ;;  %s693_s15 = sld [smem:[#allocation6 + $0x1]] (%p477_p11)  ;;  %v550_v58 = vand.u32 (%p477_p11), 127, %v549_v57 }
 0x3a1   : > { %s694_s16 = sld [smem:[#allocation6 + $0x81]] (%p477_p11)  ;;  %s697_s17 = sld [smem:[#allocation6 + $0x3]] (%p477_p11) }
 0x3a2   : > { %s698_s18 = sld [smem:[#allocation6 + $0x83]] (%p477_p11)  ;;  %vm562_vm12 = vcmp.eq.s32.totalorder (%p477_p11), %v550_v58, 0  ;;  %vm574_vm13 = vcmp.eq.s32.totalorder (%p477_p11), %v550_v58, 1  ;;  %vm586_vm14 = vcmp.eq.s32.totalorder (%p477_p11), %v550_v58, 2  ;;  %vm598_vm15 = vcmp.eq.s32.totalorder (%p477_p11), %v550_v58, 3 }
 0x3a4   : > { %s552_s19 = scalar_lea.vmem (%p477_p11), [#allocation4], %s551_s11 }
 0x3a5   : > { %v553_v41 = vld [vmem:[%s552_s19] sm:$0x1]  ;;  %s555_s20 = scalar_lea.vmem [#allocation4], %s692_s12  ;;  %s577_s21 = scalar_lea.vmem [#allocation4], %s695_s13 }
 0x3a6   : > { %v556_v42 = vld [vmem:[%s555_s20] sm:$0x1]  ;;  %s580_s22 = scalar_lea.vmem [#allocation4], %s696_s14  ;;  %s565_s29 = scalar_lea.vmem [#allocation4], %s693_s15 }
 0x3a7   : > { %v557_v43 = vmul.f32 %v556_v42, %v553_v41  ;;  %v578_v44 = vld [vmem:[%s577_s21] sm:$0x1]  ;;  %s568_s23 = scalar_lea.vmem [#allocation4], %s694_s16  ;;  %s589_s24 = scalar_lea.vmem [#allocation4], %s697_s17 }
 0x3a8   : > { %v581_v45 = vld [vmem:[%s580_s22] sm:$0x1]  ;;  %s592_s25 = scalar_lea.vmem [#allocation4], %s698_s18 }
 0x3a9   : > { %v582_v46 = vmul.f32 %v581_v45, %v578_v44  ;;  %v566_v47 = vld [vmem:[%s565_s29] sm:$0x1]  ;;  %v559_v49 = vsel %vm558_vm11, %v557_v43, 0.0 }
 0x3aa   : > { %v569_v48 = vld [vmem:[%s568_s23] sm:$0x1]  ;;  %560 = vadd.xlane.f32.xlu0 %v559_v49 }
 0x3ab   : > { %v570_v50 = vmul.f32 %v569_v48, %v566_v47  ;;  %v590_v51 = vld [vmem:[%s589_s24] sm:$0x1]  ;;  %v583_v53 = vsel %vm558_vm11, %v582_v46, 0.0 }
 0x3ac   : > { %v593_v52 = vld [vmem:[%s592_s25] sm:$0x1]  ;;  %584 = vadd.xlane.f32.xlu1 %v583_v53 }
 0x3ad   : > { %v594_v54 = vmul.f32 %v593_v52, %v590_v51  ;;  %v571_v55 = vsel %vm558_vm11, %v570_v50, 0.0 }
 0x3ae   : > { %572 = vadd.xlane.f32.xlu0 %v571_v55 }
 0x3af   : > { %v595_v56 = vsel %vm558_vm11, %v594_v54, 0.0 }
 0x3b0   : > { %596 = vadd.xlane.f32.xlu1 %v595_v56 }
 0x437   : > { %v561_v59 = vpop.xlane.xlu0 %560 }
 0x438   : > { %v563_v61 = vsel %vm562_vm12, %v561_v59, 0.0 }
 0x439   : > { %v585_v60 = vpop.xlane.xlu1 %584 }
 0x43b   : > { %v573_v62 = vpop.xlane.xlu0 %572 }
 0x43c   : > { %v575_v63 = vsel %vm574_vm13, %v573_v62, %v563_v61 }
 0x43d   : > { %v597_v0 = vpop.xlane.xlu1 %596  ;;  %v587_v1 = vsel %vm586_vm14, %v585_v60, %v575_v63 }
 0x43e   : > { %v599_v2 = vsel %vm598_vm15, %v597_v0, %v587_v1 }
 0x43f   : > { %600 = vst [vmem:[#allocation7] sm:$0x1] %v599_v2 }
 0x440 PF: > { %p973_p13 = scmp.eq.s32.totalorder %s671_s0, 1  ;;  %s866_s27 = smov [#allocation7]  }
 0x441   : > { %s608_s28 = sshll.u32 %s866_s27, 4  ;;  %s609_s28 = int_to_ptr.vmem [resolvable:$true] %s608_s28 }
 0x442   : > { %s803_s10 = scalar_lea.vmem %s609_s28, 16  ;;  %s809_s11 = scalar_lea.vmem %s609_s28, 32 }
 0x443   : > { %p804_p0 = scmp.ne.s32.totalorder %s609_s28, %s803_s10  ;;  %p810_p3 = scmp.lt.s32.totalorder %s609_s28, %s609_s28 }
 0x444   : > { %p811_p4 = scmp.lt.s32.totalorder %s809_s11, %s803_s10 }
 0x445   : > { %p805_p1 = pnand %p804_p0, %p973_p13 }
 0x446   : > { %p812_p5 = por %p811_p4, %p810_p3 }
 0x447   : > { %p806_p2 = pneg %p805_p1 }
 0x449   : > { %p813_p6 = pnand %p812_p5, %p806_p2 }
 0x44b   : > { %816 = shalt.err (!%p813_p6)
}
 0x44c   : > { %s817_s13 = scalar_lea.hbm %s1015_s7, 16 }
 0x44d   : > { %p818_p7 = scmp.ne.s32.totalorder %s1015_s7, %s817_s13  ;;  %p823_p10 = scmp.lt.u32.totalorder %s817_s13, %s1015_s7 }
 0x44f   : > { %p819_p8 = pnand %p818_p7, %p973_p13 }
 0x451   : > { %p820_p9 = pneg %p819_p8 }
 0x453   : > { %p825_p11 = pnand %p823_p10, %p820_p9 }
 0x455   : > { %828 = shalt.err (!%p825_p11)
}
 0x456   : > { %747 = dma.vmem_to_hbm [thread:$0]  (%p973_p13), %s609_s28, 16, %s1015_s7, [#allocation8]  }
 0x457   : > { %844 = dma.done.wait (%p973_p13), [#allocation8], 16  }
 0x458   : > { %846 = vsyncadd (%p973_p13), [#allocation8], 4294967280 }
 0x459 PF: > { %s24_s8 = sadd.s32 1, %s857_s8   ;;  %s1017_s29 = smov %s853_s30 }
 0x45a   : > { %p21_p12 = scmp.ge.s32.totalorder %s24_s8, 4   ;;  %s1018_s30 = smov %s1020_s9 }
 0x45c   :  { %23 = sbr.rel (!%p21_p12) target bundleno = 17 (0x11), region = 97 }
 0x463   :  { %621 = vsyncpa [#allocation8], 1 }
 0x464   :  { %623 = vsyncpa [#allocation8 + $0x1], 1 }

</bundles_post_ra>
